<compile_context>
chip_gen: v7x
topology: tpu7x:2x2x1
jax: 0.10.0
libtpu: 0.0.40
codegen_flags: <defaults>
</compile_context>

<pallas_src>
import functools
import math

import jax
import jax.numpy as jnp
from jax.experimental import pallas as pl
from jax.experimental.pallas import tpu as pltpu


def _conv_block_kernel(x_ref, w_ref, sb_ref, o_ref, *, L):
    # x_ref : (C, TL) f32   channel-major slab, TL = BN*L (batch block merged into lanes)
    # w_ref : (C, 3C) bf16  packed conv taps: w_ref[o, k*C + c] = W[o, c, k]
    # sb_ref: (C, 2)  f32   col 0 = fused BN scale, col 1 = fused (conv bias + BN) bias
    # o_ref : (C, TL)       output slab (f32 by default)
    C, TL = x_ref.shape
    mdt = w_ref.dtype

    x = x_ref[...]                                                   # f32: residual + tap source
    pos = jax.lax.broadcasted_iota(jnp.int32, (C, TL), 1) % L        # position within each sequence

    # k=0 tap reads x[l-1]; k=2 tap reads x[l+1]. roll() is cyclic over the whole slab, so the
    # same mask that implements the conv's zero padding also zeroes the batch seams.
    x_m1 = jnp.where(pos == 0, 0.0, pltpu.roll(x, 1, axis=1))        # shift right by 1
    x_p1 = jnp.where(pos == L - 1, 0.0, pltpu.roll(x, TL - 1, axis=1))  # shift left by 1

    # Single K=3C contraction on the MXU: bf16 operands, f32 accumulation.
    xk = jnp.concatenate([x_m1, x, x_p1], axis=0).astype(mdt)        # (3C, TL)
    acc = jnp.dot(w_ref[...], xk, preferred_element_type=jnp.float32)  # (C, TL) f32

    # f32 epilogue: fused BatchNorm1d(eval) + conv bias, LeakyReLU(0.01), residual add.
    scale = sb_ref[:, 0:1]                                           # (C, 1)
    bias = sb_ref[:, 1:2]                                            # (C, 1)
    y = acc * scale + bias
    y = jnp.where(y >= 0, y, 0.01 * y)
    o_ref[...] = (x + y).astype(o_ref.dtype)


def _vmem_capacity_bytes():
    # Generation-aware VMEM capacity (v7x: 64 MiB, v5e/v6e: 128 MiB); conservative fallback.
    try:
        info = pltpu.get_tpu_info()
        cap = getattr(info, "vmem_capacity_bytes", None)
        if cap:
            return int(cap)
    except Exception:
        pass
    return 64 * 1024 * 1024


def _pick_batch_block(N, C, L, vmem_budget_bytes, out_itemsize):
    """Batch elements per grid step, sized by VMEM budget + a per-step traffic target."""
    # Approx per-batch-element VMEM: double-buffered f32 input + output, bf16 (3C,L) tap slab,
    # f32 accumulator + epilogue temporaries, bf16 cast.
    per_b_vmem = C * L * (2 * 4 + 2 * out_itemsize + 3 * 2 + 4 + 4 + 2)
    # Target ~4 MiB of HBM traffic per grid step (>> ~0.35 us per-step overhead).
    per_b_traffic = C * L * (4 + out_itemsize)
    bn = min(max(1, vmem_budget_bytes // per_b_vmem),
             max(1, (4 * 1024 * 1024) // per_b_traffic))
    if bn >= N:
        return N                       # single block == full array -> no alignment constraint
    # Multiple grid steps: keep the block's lane extent (BN*L) a multiple of 128 when possible.
    step = 128 // math.gcd(L, 128)
    bn_aligned = (bn // step) * step
    if bn_aligned >= 1:
        return bn_aligned
    # TODO(synk): if even one batch element overflows the budget, tile L with a halo instead.
    return bn


@functools.partial(jax.jit, static_argnames=("matmul_dtype", "out_dtype"))
def conv_block(x, weight, conv_bias, gamma, beta, running_mean, running_var,
               eps=1e-5, matmul_dtype=jnp.bfloat16, out_dtype=None):
    """x: (N, C, L). weight: (C, C, 3). Returns x + LeakyReLU(BN(Conv1d(x))) (eval-mode BN)."""
    N, C, L = x.shape
    out_dtype = jnp.float32 if out_dtype is None else out_dtype
    out_itemsize = jnp.dtype(out_dtype).itemsize

    # Fold conv bias + BatchNorm (eval mode, running stats) into per-channel scale/bias.
    scale = gamma / jnp.sqrt(running_var + eps)
    bias = (conv_bias - running_mean) * scale + beta
    sb = jnp.stack([scale, bias], axis=1).astype(jnp.float32)                  # (C, 2)

    # Pack conv taps as (C_out, 3*C_in): w2[o, k*C + c] = W[o, c, k] -> single K=3C contraction.
    w2 = jnp.transpose(weight, (0, 2, 1)).reshape(C, 3 * C).astype(matmul_dtype)

    vmem_cap = _vmem_capacity_bytes()
    vmem_limit = int(vmem_cap * 0.75)                  # ~48 MiB on v7x, ~96 MiB on v5e/v6e

    BN = _pick_batch_block(N, C, L, int(vmem_limit * 0.7), out_itemsize)
    n_steps = -(-N // BN)                              # cdiv: no N % BN == 0 requirement
    N_pad = n_steps * BN

    # Channel-major, batch+length merged into the lane axis -> lane-dense loads/stores.
    xt = jnp.transpose(x, (1, 0, 2)).astype(jnp.float32)                       # (C, N, L)
    if N_pad != N:
        xt = jnp.pad(xt, ((0, 0), (0, N_pad - N), (0, 0)))
    x2 = xt.reshape(C, N_pad * L)                                              # (C, N_pad*L)

    TL = BN * L
    out2 = pl.pallas_call(
        functools.partial(_conv_block_kernel, L=L),
        out_shape=jax.ShapeDtypeStruct((C, N_pad * L), out_dtype),
        grid_spec=pltpu.PrefetchScalarGridSpec(
            num_scalar_prefetch=0,
            grid=(n_steps,),
            in_specs=[
                pl.BlockSpec((C, TL), lambda n: (0, n)),        # x slab
                pl.BlockSpec((C, 3 * C), lambda n: (0, 0)),     # packed weights (resident)
                pl.BlockSpec((C, 2), lambda n: (0, 0)),         # fused scale/bias
            ],
            out_specs=pl.BlockSpec((C, TL), lambda n: (0, n)),
        ),
        compiler_params=pltpu.CompilerParams(
            dimension_semantics=("parallel",),
            vmem_limit_bytes=vmem_limit,
        ),
        cost_estimate=pl.CostEstimate(
            flops=2 * N_pad * C * (3 * C) * L,
            transcendentals=0,
            bytes_accessed=N_pad * C * L * 4                               # f32 x read
            + C * 3 * C * jnp.dtype(matmul_dtype).itemsize                 # packed weights
            + C * 2 * 4                                                    # scale/bias
            + N_pad * C * L * out_itemsize,                                # output write
        ),
    )(x2, w2, sb)

    out = out2.reshape(C, N_pad, L)[:, :N, :]
    return jnp.transpose(out, (1, 0, 2))                                   # (N, C, L)


def _reference(x, weight, conv_bias, gamma, beta, running_mean, running_var, eps=1e-5):
    # Pure-JAX reference of the same (eval-mode) forward.
    N, C, L = x.shape
    x_pad = jnp.pad(x, ((0, 0), (0, 0), (1, 1)))
    conv = jnp.zeros((N, C, L), jnp.float32)
    for k in range(3):
        conv = conv + jnp.einsum("oc,ncl->nol", weight[:, :, k], x_pad[:, :, k:k + L])
    conv = conv + conv_bias[None, :, None]
    y = (conv - running_mean[None, :, None]) / jnp.sqrt(running_var[None, :, None] + eps)
    y = y * gamma[None, :, None] + beta[None, :, None]
    y = jnp.where(y >= 0, y, 0.01 * y)
    return x + y


if __name__ == "__main__":
    key = jax.random.PRNGKey(0)
    N, C, L = 2, 4, 16  # small shapes: batch=2, c_h=4, seq length=16

    k_x, k_w, k_b, k_g, k_be, k_rm, k_rv = jax.random.split(key, 7)
    x = jax.random.normal(k_x, (N, C, L), jnp.float32)

    # Conv1d(c_h, c_h, kernel_size=3) params (uniform, like PyTorch default range).
    bound = 1.0 / (C * 3) ** 0.5
    weight = jax.random.uniform(k_w, (C, C, 3), jnp.float32, -bound, bound)
    conv_bias = jax.random.uniform(k_b, (C,), jnp.float32, -bound, bound)

    # BatchNorm1d(c_h) params / running stats (eval mode).
    gamma = 1.0 + 0.1 * jax.random.normal(k_g, (C,), jnp.float32)
    beta = 0.1 * jax.random.normal(k_be, (C,), jnp.float32)
    running_mean = 0.1 * jax.random.normal(k_rm, (C,), jnp.float32)
    running_var = 1.0 + 0.1 * jax.random.uniform(k_rv, (C,), jnp.float32)

    out = conv_block(x, weight, conv_bias, gamma, beta, running_mean, running_var)
    out = jax.block_until_ready(out)
    assert out.shape == (N, C, L)
    assert out.dtype == jnp.float32

    # Tight check: conv path evaluated on the same bf16-quantized operands the MXU sees,
    # residual kept in full f32 (exactly what the kernel does).
    xq = x.astype(jnp.bfloat16).astype(jnp.float32)
    wq = weight.astype(jnp.bfloat16).astype(jnp.float32)
    ref_tight = x + (_reference(xq, wq, conv_bias, gamma, beta, running_mean, running_var) - xq)
    assert jnp.max(jnp.abs(out - ref_tight)) < 2e-3, "mismatch vs bf16-quantized-conv reference"

    # Loose sanity check vs. the full-f32 reference (only MXU bf16 quantization differs).
    ref_f32 = _reference(x, weight, conv_bias, gamma, beta, running_mean, running_var)
    assert jnp.max(jnp.abs(out - ref_f32)) < 5e-2, "mismatch vs f32 reference"

    print("KERNEL_OK")
</pallas_src>

<mosaic_0001>
module attributes {stable_mosaic.version = 11 : i64} {
  func.func @_conv_block_kernel(%arg0: i32, %arg1: memref<4x32xf32, #tpu.memory_space<vmem>>, %arg2: memref<4x12xbf16, #tpu.memory_space<vmem>>, %arg3: memref<4x2xf32, #tpu.memory_space<vmem>>, %arg4: memref<4x32xf32, #tpu.memory_space<vmem>>) attributes {dimension_semantics = [#tpu.dimension_semantics<parallel>], iteration_bounds = array<i64: 1>, scalar_prefetch = 0 : i64, scratch_operands = 0 : i64, tpu.core_type = #tpu.core_type<tc>, window_params = [{transform_indices = @transform_0, window_bounds = array<i64: 4, 32>}, {pipeline_mode = #tpu.pipeline_mode<synchronous>, transform_indices = @transform_1, window_bounds = array<i64: 4, 12>}, {pipeline_mode = #tpu.pipeline_mode<synchronous>, transform_indices = @transform_2, window_bounds = array<i64: 4, 2>}, {transform_indices = @transform_3, window_bounds = array<i64: 4, 32>}]} {
    %c0 = arith.constant 0 : index
    %c0_0 = arith.constant 0 : index
    %0 = vector.load %arg1[%c0, %c0_0] : memref<4x32xf32, #tpu.memory_space<vmem>>, vector<4x32xf32>
    %1 = tpu.iota {dimensions = array<i32: 1>} : vector<4x32xi32>
    %c16_i32 = arith.constant 16 : i32
    %c0_i32 = arith.constant 0 : i32
    %2 = arith.cmpi eq, %c16_i32, %c0_i32 : i32
    %c1_i32 = arith.constant 1 : i32
    %3 = arith.select %2, %c1_i32, %c16_i32 : i32
    %4 = vector.broadcast %3 : i32 to vector<4x32xi32>
    %5 = arith.remsi %1, %4 : vector<4x32xi32>
    %c0_i32_1 = arith.constant 0 : i32
    %6 = vector.broadcast %c0_i32_1 : i32 to vector<4x32xi32>
    %7 = arith.cmpi ne, %5, %6 : vector<4x32xi32>
    %c0_i32_2 = arith.constant 0 : i32
    %8 = vector.broadcast %c0_i32_2 : i32 to vector<4x32xi32>
    %9 = arith.cmpi slt, %5, %8 : vector<4x32xi32>
    %c0_i32_3 = arith.constant 0 : i32
    %10 = arith.cmpi slt, %3, %c0_i32_3 : i32
    %11 = vector.broadcast %10 : i1 to vector<4x32xi1>
    %12 = vector.broadcast %11 : vector<4x32xi1> to vector<4x32xi1>
    %13 = arith.xori %9, %12 : vector<4x32xi1>
    %14 = arith.andi %13, %7 : vector<4x32xi1>
    %15 = vector.broadcast %3 : i32 to vector<4x32xi32>
    %16 = arith.addi %5, %15 : vector<4x32xi32>
    %17 = arith.select %14, %16, %5 : vector<4x32xi1>, vector<4x32xi32>
    %c0_i32_4 = arith.constant 0 : i32
    %18 = vector.broadcast %c0_i32_4 : i32 to vector<4x32xi32>
    %19 = arith.cmpi eq, %17, %18 : vector<4x32xi32>
    %c1_i32_5 = arith.constant 1 : i32
    %20 = tpu.dynamic_rotate %0 by %c1_i32_5 dim 1 : vector<4x32xf32>, i32 -> vector<4x32xf32>
    %cst = arith.constant 0.000000e+00 : f32
    %21 = vector.broadcast %cst : f32 to vector<4x32xf32>
    %22 = arith.select %19, %21, %20 : vector<4x32xi1>, vector<4x32xf32>
    %c15_i32 = arith.constant 15 : i32
    %23 = vector.broadcast %c15_i32 : i32 to vector<4x32xi32>
    %24 = arith.cmpi eq, %17, %23 : vector<4x32xi32>
    %c31_i32 = arith.constant 31 : i32
    %25 = tpu.dynamic_rotate %0 by %c31_i32 dim 1 : vector<4x32xf32>, i32 -> vector<4x32xf32>
    %cst_6 = arith.constant 0.000000e+00 : f32
    %26 = vector.broadcast %cst_6 : f32 to vector<4x32xf32>
    %27 = arith.select %24, %26, %25 : vector<4x32xi1>, vector<4x32xf32>
    %28 = tpu.concatenate %22, %0, %27 in 0 : vector<4x32xf32>, vector<4x32xf32>, vector<4x32xf32> -> vector<12x32xf32>
    %29 = arith.truncf %28 : vector<12x32xf32> to vector<12x32xbf16>
    %c0_7 = arith.constant 0 : index
    %c0_8 = arith.constant 0 : index
    %30 = vector.load %arg2[%c0_7, %c0_8] : memref<4x12xbf16, #tpu.memory_space<vmem>>, vector<4x12xbf16>
    %cst_9 = arith.constant dense<0.000000e+00> : vector<4x32xf32>
    %31 = tpu.matmul %30, %29, %cst_9 {dimension_numbers = #tpu.dot_dimension_numbers<[1], [0], [0], [1], [0, 0, 1, 1], [], []>} : vector<4x12xbf16>, vector<12x32xbf16>, vector<4x32xf32> -> vector<4x32xf32>
    %c0_10 = arith.constant 0 : index
    %c0_11 = arith.constant 0 : index
    %32 = vector.load %arg3[%c0_10, %c0_11] : memref<4x2xf32, #tpu.memory_space<vmem>>, vector<4x1xf32>
    %c0_12 = arith.constant 0 : index
    %c1 = arith.constant 1 : index
    %33 = vector.load %arg3[%c0_12, %c1] : memref<4x2xf32, #tpu.memory_space<vmem>>, vector<4x1xf32>
    %34 = vector.broadcast %32 : vector<4x1xf32> to vector<4x32xf32>
    %35 = arith.mulf %31, %34 : vector<4x32xf32>
    %36 = vector.broadcast %33 : vector<4x1xf32> to vector<4x32xf32>
    %37 = arith.addf %35, %36 : vector<4x32xf32>
    %cst_13 = arith.constant 0.000000e+00 : f32
    %38 = vector.broadcast %cst_13 : f32 to vector<4x32xf32>
    %39 = arith.cmpf oge, %37, %38 : vector<4x32xf32>
    %cst_14 = arith.constant 0.00999999977 : f32
    %40 = vector.broadcast %cst_14 : f32 to vector<4x32xf32>
    %41 = arith.mulf %40, %37 : vector<4x32xf32>
    %42 = arith.select %39, %37, %41 : vector<4x32xi1>, vector<4x32xf32>
    %43 = arith.addf %0, %42 : vector<4x32xf32>
    %c0_15 = arith.constant 0 : index
    %c0_16 = arith.constant 0 : index
    %44 = vector.load %arg4[%c0_15, %c0_16] : memref<4x32xf32, #tpu.memory_space<vmem>>, vector<4x32xf32>
    tpu.vector_store %arg4[%c0_15, %c0_16], %43 {strides = array<i32>} : memref<4x32xf32, #tpu.memory_space<vmem>>, vector<4x32xf32>,
    return
  }
  func.func @transform_0(%arg0: i32) -> (i32, i32) {
    %c0_i32 = arith.constant 0 : i32
    %c0_i32_0 = arith.constant 0 : i32
    return %c0_i32, %arg0 : i32, i32
  }
  func.func @transform_1(%arg0: i32) -> (i32, i32) {
    %c0_i32 = arith.constant 0 : i32
    %c0_i32_0 = arith.constant 0 : i32
    %c0_i32_1 = arith.constant 0 : i32
    return %c0_i32, %c0_i32_0 : i32, i32
  }
  func.func @transform_2(%arg0: i32) -> (i32, i32) {
    %c0_i32 = arith.constant 0 : i32
    %c0_i32_0 = arith.constant 0 : i32
    %c0_i32_1 = arith.constant 0 : i32
    return %c0_i32, %c0_i32_0 : i32, i32
  }
  func.func @transform_3(%arg0: i32) -> (i32, i32) {
    %c0_i32 = arith.constant 0 : i32
    %c0_i32_0 = arith.constant 0 : i32
    return %c0_i32, %arg0 : i32, i32
  }
}

</mosaic_0001>

<bundles_post_ra>
// kernel: conv_block.1
= control target key start
LH: loop header
LB: loop body
LE: loop exit
PB: predicated region body
PF: predicated region fallthrough
CT: control target
= control target key end

     0   :  { %s144_s14 = smov 32   ;;  %vm31_vm0 = vcmask 1047808   ;;  %v145_v3 = vmov 0.0   ;;  %vm146_vm1 = vmmov 0   ;;  %v147_v6 = vmov 0   ;;  %s150_s17 = smov 127   ;;  %s183_s0 = inlined_call_operand.vmem [shape: f32[4,32], index: 0, kind: input, shape index: {}]   ;;  %s184_s2 = inlined_call_operand.vmem [shape: f32[4,2], index: 2, kind: input, shape index: {}]   ;;  %s185_s1 = inlined_call_operand.vmem [shape: bf16[4,12], index: 1, kind: input, shape index: {}]   ;;  %s186_s3 = inlined_call_operand.vmem [shape: f32[4,32], index: 3, kind: output, shape index: {}]  }
   0x1   :  { %v15_v0 = vld [vmem:[%s183_s0] sm:$0xf]  ;;  %128 = vmatprep.subr.bf16.mxu0 %v145_v3  ;;  %130 = vmatprep.mubr.msk.bf16.mxu0 %vm146_vm1, %v145_v3  ;;  %v148_v8 = vmov 1   ;;  %s149_s0 = smov 97   ;;  %v16_v9 = vlaneseq  ;;  %vm51_vm4 = vcmask 1043456   ;;  %vm59_vm5 = vcmask 1045504  }
   0x2   :  { %32 = vrot.lane.b32.xlu0 %v15_v0, %s144_s14  ;;  %v103_v7 = vld [vmem:[%s184_s2] sm:$0xf]  ;;  %142 = vset.pattern.permute.xlu1 %v148_v8  ;;  %v49_v13 = vrot.slane %v15_v0, 4  ;;  %vm55_vm6 = vcmask 97280   ;;  %vm119_vm8 = vcmask 257024  }
   0x3   :  { %141 = vset.pattern.permute.xlu0 %v147_v6  ;;  %v17_v10 = vand.u32 127, %v16_v9  ;;  %v54_v20 = vld [vmem:[%s185_s1] sm:$0x3] }
   0x5   :  { %v22_v11 = vand.u32 15, %v17_v10 }
   0x7   :  { %vm30_vm2 = vcmp.eq.s32.totalorder %v22_v11, 0  ;;  %vm43_vm3 = vcmp.eq.s32.totalorder %v22_v11, 15 }
  0x74   :  { %v33_v1 = vpop.permute.xlu0 %32 }
  0x75   :  { %v34_v2 = vsel %vm31_vm0, %v33_v1, %v15_v0 }
  0x76   :  { %35 = vrot.lane.b32.xlu0 %v34_v2, %s144_s14 }
  0x7a   :  { %106 = vperm.xlu0 %141, %v103_v7  }
  0x7e   :  { %143 = vset.pattern.permute.xlu0 %v148_v8 }
  0xe8   :  { %v36_v4 = vpop.permute.xlu0 %35 }
  0xe9   :  { %v37_v5 = vsel %vm31_vm0, %v36_v4, %v15_v0 }
  0xea   :  { %39 = vrot.lane.b32.xlu1 %v37_v5, %s149_s0 }
  0xee   :  { %44 = vrot.lane.b32.xlu1 %v37_v5, %s150_s17 }
  0xf2   :  { %111 = vperm.xlu1 %142, %v103_v7  }
  0xf9   :  { %v107_v21 = vpop.permute.xlu0 %106 }
 0x15c   :  { %v40_v12 = vpop.permute.xlu1 %39 }
 0x15d   :  { %v42_v14 = vsel %vm30_vm2, 0.0, %v40_v12 }
 0x15e   :  { %v52_v17 = vsel %vm51_vm4, %v42_v14, %v49_v13 }
 0x160   :  { %v45_v15 = vpop.permute.xlu1 %44 }
 0x161   :  { %v47_v16 = vsel %vm43_vm3, 0.0, %v45_v15 }
 0x162   :  { %v53_v18 = vpack.c.bf16 %v47_v16, %v52_v17 }
 0x164   :  { %v61_v19 = vsel %vm59_vm5, %v53_v18, 0 }
 0x165   :  { %129 = vmatpush3.bf16.msra.mxu0 %v61_v19 }
 0x168   :  { %131 = vmatmul.mubr.msk.bf16.vlgmr.msra.gmra.mrb[0].mxu0 %vm55_vm6, %v54_v20 }
 0x171   :  { %v112_v23 = vpop.permute.xlu1 %111 }
 0x23b   :  { %v97_v22 = vpop.f32.mrb[0].mxu0 }
 0x23c   :  { %v109_v24 = vmul.f32 %v107_v21, %v97_v22  ;;  %v132_v25 = vpop.f32.mrb[1].mxu0 }
 0x23d   :  { %v100_v26 = vpop.f32.mrb[2].mxu0 }
 0x23e   :  { %v114_v27 = vadd.f32 %v112_v23, %v109_v24  ;;  %v133_v28 = vpop.f32.mrb[3].mxu0 }
 0x240   :  { %vm115_vm7 = vcmp.ge.f32.partialorder %v114_v27, 0.0  ;;  %v116_v29 = vmul.f32 0.01, %v114_v27 }
 0x242   :  { %v117_v30 = vsel %vm115_vm7, %v114_v27, %v116_v29 }
 0x243   :  { %v118_v31 = vadd.f32 %v117_v30, %v15_v0 }
 0x245   :  { %120 = vst.msk [vmem:[%s186_s3] sm:$0xf] %vm119_vm8, %v118_v31 }

</bundles_post_ra>
